<compile_context>
chip_gen: v7x
topology: tpu7x:2x2x1
jax: 0.10.0
libtpu: 0.0.40
codegen_flags: <defaults>
</compile_context>

<pallas_src>
import functools

import jax
import jax.numpy as jnp
from jax.experimental import pallas as pl
from jax.experimental.pallas import tpu as pltpu


def _round_up(n, m):
    return ((n + m - 1) // m) * m


def _act(x, af):
    # af == 0 -> ReLU, else sigmoid (matches the PyTorch module's branching).
    if af == 0:
        return jnp.maximum(x, 0.0)
    return jax.nn.sigmoid(x)


def qnet_kernel(x_ref, w1_ref, b1_ref, w2_ref, b2_ref, w3_ref, b3_ref, o_ref,
                *, af1, af2):
    """One batch tile: (TB, S) -> (TB, OUT_PAD). Dots in bf16 (MXU), f32 acc,
    bias add + activations in f32."""
    x = x_ref[...]                                                    # bf16 (TB, S)
    h1 = jnp.dot(x, w1_ref[...],
                 preferred_element_type=jnp.float32) + b1_ref[...]    # f32 (TB, n_fc1)
    h1 = _act(h1, af1)
    h2 = jnp.dot(h1.astype(w2_ref.dtype), w2_ref[...],
                 preferred_element_type=jnp.float32) + b2_ref[...]    # f32 (TB, n_fc2)
    h2 = _act(h2, af2)
    out = jnp.dot(h2.astype(w3_ref.dtype), w3_ref[...],
                  preferred_element_type=jnp.float32) + b3_ref[...]   # f32 (TB, OUT_PAD)
    o_ref[...] = out.astype(o_ref.dtype)


def qnet_forward(x, params, af1, af2, *, block_b=256, mxu_dtype=jnp.bfloat16):
    """x: (B, state_size) float32. params: pre-transposed weights/biases (f32).
    Returns (B, action_size) float32."""
    w1, b1 = params["w1"], params["b1"]
    w2, b2 = params["w2"], params["b2"]
    w3, b3 = params["w3"], params["b3"]

    B, S = x.shape
    A = w3.shape[1]
    OUT_PAD = _round_up(A, 128)          # lane-dense output width

    # Pad fc3 to 128 output lanes (zeros -> extra lanes are exact zeros + bias 0).
    w3p = jnp.zeros((w3.shape[0], OUT_PAD), jnp.float32).at[:, :A].set(w3)
    b3p = jnp.zeros((1, OUT_PAD), jnp.float32).at[:, :A].set(b3)

    # bf16 operands for the MXU; biases stay f32 (f32 accumulate / activations).
    xq = x.astype(mxu_dtype)
    w1q, w2q, w3q = (w.astype(mxu_dtype) for w in (w1, w2, w3p))

    # Batch tile: multiple of 8 sublanes, capped at block_b, batch padded to a
    # TB multiple so the last grid step is a full tile (padded rows sliced off).
    tb = _round_up(min(block_b, _round_up(B, 8)), 8)
    Bp = _round_up(B, tb)
    if Bp != B:
        xq = jnp.pad(xq, ((0, Bp - B), (0, 0)))
    grid = (Bp // tb,)

    # Weights/biases: full-array blocks with constant index_map -> VMEM-resident.
    const = lambda arr: pl.BlockSpec(arr.shape, lambda i: (0,) * arr.ndim)

    kernel = functools.partial(qnet_kernel, af1=af1, af2=af2)

    out = pl.pallas_call(
        kernel,
        out_shape=jax.ShapeDtypeStruct((Bp, OUT_PAD), jnp.float32),
        grid=grid,
        in_specs=[
            pl.BlockSpec((tb, S), lambda i: (i, 0)),   # x: streamed by batch tile
            const(w1q), const(b1),
            const(w2q), const(b2),
            const(w3q), const(b3p),
        ],
        out_specs=pl.BlockSpec((tb, OUT_PAD), lambda i: (i, 0)),
        compiler_params=pltpu.CompilerParams(
            dimension_semantics=("parallel",)),        # shard batch across TCs (v7x)
    )(xq, w1q, b1, w2q, b2, w3q, b3p)

    return out[:B, :A]


def init_qnet_params(key, state_size, action_size, n_fc1, n_fc2):
    """Deterministic init mimicking nn.Linear's U(-1/sqrt(fan_in), 1/sqrt(fan_in)).
    Weights stored as (in_features, out_features); biases as (1, out)."""
    def linear(k, fan_in, fan_out):
        kw, kb = jax.random.split(k)
        bound = 1.0 / jnp.sqrt(float(fan_in))
        w = jax.random.uniform(kw, (fan_in, fan_out), jnp.float32, -bound, bound)
        b = jax.random.uniform(kb, (1, fan_out), jnp.float32, -bound, bound)
        return w, b

    k1, k2, k3 = jax.random.split(key, 3)
    w1, b1 = linear(k1, state_size, n_fc1)
    w2, b2 = linear(k2, n_fc1, n_fc2)
    w3, b3 = linear(k3, n_fc2, action_size)
    return {"w1": w1, "b1": b1, "w2": w2, "b2": b2, "w3": w3, "b3": b3}


def qnet_reference(x, params, af1, af2, mxu_dtype=jnp.bfloat16):
    """Pure-JAX reference with the same bf16-operand / f32-accumulate precision."""
    c = lambda a: a.astype(mxu_dtype)
    h1 = _act(jnp.dot(c(x), c(params["w1"]),
                      preferred_element_type=jnp.float32) + params["b1"], af1)
    h2 = _act(jnp.dot(c(h1), c(params["w2"]),
                      preferred_element_type=jnp.float32) + params["b2"], af2)
    return jnp.dot(c(h2), c(params["w3"]),
                   preferred_element_type=jnp.float32) + params["b3"]


if __name__ == "__main__":
    # LunarLander-like sizes, kept small.
    state_size, action_size = 8, 4
    n_fc1, n_fc2 = 64, 32
    af1, af2 = 0, 1       # fc1 -> ReLU, fc2 -> sigmoid

    key = jax.random.PRNGKey(0)
    kx, kp, kx2 = jax.random.split(key, 3)
    params = init_qnet_params(kp, state_size, action_size, n_fc1, n_fc2)

    # Small canonical case (batch=2): pads to one 8-row tile, 128-lane output.
    x = jax.random.normal(kx, (2, state_size), jnp.float32)
    out = jax.block_until_ready(qnet_forward(x, params, af1, af2))
    ref = qnet_reference(x, params, af1, af2)
    assert out.shape == (2, action_size)
    assert jnp.allclose(out, ref, atol=2e-3, rtol=2e-3), "mismatch vs reference (B=2)"

    # Exercise the batch grid + padding path (B not a multiple of the tile).
    x2 = jax.random.normal(kx2, (37, state_size), jnp.float32)
    out2 = jax.block_until_ready(qnet_forward(x2, params, af1, af2, block_b=16))
    ref2 = qnet_reference(x2, params, af1, af2)
    assert out2.shape == (37, action_size)
    assert jnp.allclose(out2, ref2, atol=2e-3, rtol=2e-3), "mismatch vs reference (B=37)"

    print("KERNEL_OK")
</pallas_src>

<mosaic_0001>
module attributes {stable_mosaic.version = 11 : i64} {
  func.func @qnet_kernel(%arg0: i32, %arg1: memref<8x8xbf16, #tpu.memory_space<vmem>>, %arg2: memref<8x64xbf16, #tpu.memory_space<vmem>>, %arg3: memref<1x64xf32, #tpu.memory_space<vmem>>, %arg4: memref<64x32xbf16, #tpu.memory_space<vmem>>, %arg5: memref<1x32xf32, #tpu.memory_space<vmem>>, %arg6: memref<32x128xbf16, #tpu.memory_space<vmem>>, %arg7: memref<1x128xf32, #tpu.memory_space<vmem>>, %arg8: memref<8x128xf32, #tpu.memory_space<vmem>>) attributes {dimension_semantics = [#tpu.dimension_semantics<parallel>], iteration_bounds = array<i64: 1>, scalar_prefetch = 0 : i64, scratch_operands = 0 : i64, tpu.core_type = #tpu.core_type<tc>, window_params = [{transform_indices = @transform_0, window_bounds = array<i64: 8, 8>}, {pipeline_mode = #tpu.pipeline_mode<synchronous>, transform_indices = @transform_1, window_bounds = array<i64: 8, 64>}, {pipeline_mode = #tpu.pipeline_mode<synchronous>, transform_indices = @transform_2, window_bounds = array<i64: 1, 64>}, {pipeline_mode = #tpu.pipeline_mode<synchronous>, transform_indices = @transform_3, window_bounds = array<i64: 64, 32>}, {pipeline_mode = #tpu.pipeline_mode<synchronous>, transform_indices = @transform_4, window_bounds = array<i64: 1, 32>}, {pipeline_mode = #tpu.pipeline_mode<synchronous>, transform_indices = @transform_5, window_bounds = array<i64: 32, 128>}, {pipeline_mode = #tpu.pipeline_mode<synchronous>, transform_indices = @transform_6, window_bounds = array<i64: 1, 128>}, {transform_indices = @transform_7, window_bounds = array<i64: 8, 128>}]} {
    %c0 = arith.constant 0 : index
    %c0_0 = arith.constant 0 : index
    %0 = vector.load %arg1[%c0, %c0_0] : memref<8x8xbf16, #tpu.memory_space<vmem>>, vector<8x8xbf16>
    %c0_1 = arith.constant 0 : index
    %c0_2 = arith.constant 0 : index
    %1 = vector.load %arg2[%c0_1, %c0_2] : memref<8x64xbf16, #tpu.memory_space<vmem>>, vector<8x64xbf16>
    %cst = arith.constant dense<0.000000e+00> : vector<8x64xf32>
    %2 = tpu.matmul %0, %1, %cst {dimension_numbers = #tpu.dot_dimension_numbers<[1], [0], [0], [1], [0, 0, 1, 1], [], []>} : vector<8x8xbf16>, vector<8x64xbf16>, vector<8x64xf32> -> vector<8x64xf32>
    %c0_3 = arith.constant 0 : index
    %c0_4 = arith.constant 0 : index
    %3 = vector.load %arg3[%c0_3, %c0_4] : memref<1x64xf32, #tpu.memory_space<vmem>>, vector<1x64xf32>
    %4 = vector.broadcast %3 : vector<1x64xf32> to vector<8x64xf32>
    %5 = arith.addf %2, %4 : vector<8x64xf32>
    %cst_5 = arith.constant 0.000000e+00 : f32
    %6 = vector.broadcast %cst_5 : f32 to vector<8x64xf32>
    %7 = arith.maximumf %5, %6 : vector<8x64xf32>
    %8 = arith.truncf %7 : vector<8x64xf32> to vector<8x64xbf16>
    %c0_6 = arith.constant 0 : index
    %c0_7 = arith.constant 0 : index
    %9 = vector.load %arg4[%c0_6, %c0_7] : memref<64x32xbf16, #tpu.memory_space<vmem>>, vector<64x32xbf16>
    %cst_8 = arith.constant dense<0.000000e+00> : vector<8x32xf32>
    %10 = tpu.matmul %8, %9, %cst_8 {dimension_numbers = #tpu.dot_dimension_numbers<[1], [0], [0], [1], [0, 0, 1, 1], [], []>} : vector<8x64xbf16>, vector<64x32xbf16>, vector<8x32xf32> -> vector<8x32xf32>
    %c0_9 = arith.constant 0 : index
    %c0_10 = arith.constant 0 : index
    %11 = vector.load %arg5[%c0_9, %c0_10] : memref<1x32xf32, #tpu.memory_space<vmem>>, vector<1x32xf32>
    %12 = vector.broadcast %11 : vector<1x32xf32> to vector<8x32xf32>
    %13 = arith.addf %10, %12 : vector<8x32xf32>
    %14 = arith.negf %13 : vector<8x32xf32>
    %15 = math.exp %14 : vector<8x32xf32>
    %cst_11 = arith.constant 1.000000e+00 : f32
    %16 = vector.broadcast %cst_11 : f32 to vector<8x32xf32>
    %17 = arith.addf %16, %15 : vector<8x32xf32>
    %18 = arith.divf %16, %17 : vector<8x32xf32>
    %19 = arith.truncf %18 : vector<8x32xf32> to vector<8x32xbf16>
    %c0_12 = arith.constant 0 : index
    %c0_13 = arith.constant 0 : index
    %20 = vector.load %arg6[%c0_12, %c0_13] : memref<32x128xbf16, #tpu.memory_space<vmem>>, vector<32x128xbf16>
    %cst_14 = arith.constant dense<0.000000e+00> : vector<8x128xf32>
    %21 = tpu.matmul %19, %20, %cst_14 {dimension_numbers = #tpu.dot_dimension_numbers<[1], [0], [0], [1], [0, 0, 1, 1], [], []>} : vector<8x32xbf16>, vector<32x128xbf16>, vector<8x128xf32> -> vector<8x128xf32>
    %c0_15 = arith.constant 0 : index
    %c0_16 = arith.constant 0 : index
    %22 = vector.load %arg7[%c0_15, %c0_16] : memref<1x128xf32, #tpu.memory_space<vmem>>, vector<1x128xf32>
    %23 = vector.broadcast %22 : vector<1x128xf32> to vector<8x128xf32>
    %24 = arith.addf %21, %23 : vector<8x128xf32>
    %c0_17 = arith.constant 0 : index
    %c0_18 = arith.constant 0 : index
    %25 = vector.load %arg8[%c0_17, %c0_18] : memref<8x128xf32, #tpu.memory_space<vmem>>, vector<8x128xf32>
    tpu.vector_store %arg8[%c0_17, %c0_18], %24 {strides = array<i32>} : memref<8x128xf32, #tpu.memory_space<vmem>>, vector<8x128xf32>,
    return
  }
  func.func @transform_0(%arg0: i32) -> (i32, i32) {
    %c0_i32 = arith.constant 0 : i32
    %c0_i32_0 = arith.constant 0 : i32
    return %arg0, %c0_i32 : i32, i32
  }
  func.func @transform_1(%arg0: i32) -> (i32, i32) {
    %c0_i32 = arith.constant 0 : i32
    %c0_i32_0 = arith.constant 0 : i32
    %c0_i32_1 = arith.constant 0 : i32
    return %c0_i32, %c0_i32_0 : i32, i32
  }
  func.func @transform_2(%arg0: i32) -> (i32, i32) {
    %c0_i32 = arith.constant 0 : i32
    %c0_i32_0 = arith.constant 0 : i32
    %c0_i32_1 = arith.constant 0 : i32
    return %c0_i32, %c0_i32_0 : i32, i32
  }
  func.func @transform_3(%arg0: i32) -> (i32, i32) {
    %c0_i32 = arith.constant 0 : i32
    %c0_i32_0 = arith.constant 0 : i32
    %c0_i32_1 = arith.constant 0 : i32
    return %c0_i32, %c0_i32_0 : i32, i32
  }
  func.func @transform_4(%arg0: i32) -> (i32, i32) {
    %c0_i32 = arith.constant 0 : i32
    %c0_i32_0 = arith.constant 0 : i32
    %c0_i32_1 = arith.constant 0 : i32
    return %c0_i32, %c0_i32_0 : i32, i32
  }
  func.func @transform_5(%arg0: i32) -> (i32, i32) {
    %c0_i32 = arith.constant 0 : i32
    %c0_i32_0 = arith.constant 0 : i32
    %c0_i32_1 = arith.constant 0 : i32
    return %c0_i32, %c0_i32_0 : i32, i32
  }
  func.func @transform_6(%arg0: i32) -> (i32, i32) {
    %c0_i32 = arith.constant 0 : i32
    %c0_i32_0 = arith.constant 0 : i32
    %c0_i32_1 = arith.constant 0 : i32
    return %c0_i32, %c0_i32_0 : i32, i32
  }
  func.func @transform_7(%arg0: i32) -> (i32, i32) {
    %c0_i32 = arith.constant 0 : i32
    %c0_i32_0 = arith.constant 0 : i32
    return %arg0, %c0_i32 : i32, i32
  }
}

</mosaic_0001>

<bundles_post_ra>
// kernel: tpu_custom_call.1
= control target key start
LH: loop header
LB: loop body
LE: loop exit
PB: predicated region body
PF: predicated region fallthrough
CT: control target
= control target key end

     0   :  { %vm41_vm0 = vcmask 1043456   ;;  %vm37_vm1 = vcmask 64512   ;;  %v345_v1 = vmov 0.0   ;;  %vm346_vm2 = vmmov 0   ;;  %s433_s0 = inlined_call_operand.vmem [shape: bf16[8,8], index: 0, kind: input, shape index: {}]   ;;  %s434_s1 = inlined_call_operand.vmem [shape: bf16[8,64], index: 1, kind: input, shape index: {}]   ;;  %s435_s2 = inlined_call_operand.vmem [shape: f32[1,64], index: 2, kind: input, shape index: {}]   ;;  %s436_s3 = inlined_call_operand.vmem [shape: bf16[64,32], index: 3, kind: input, shape index: {}]   ;;  %s437_s4 = inlined_call_operand.vmem [shape: f32[1,32], index: 4, kind: input, shape index: {}]   ;;  %s438_s5 = inlined_call_operand.vmem [shape: bf16[32,128], index: 5, kind: input, shape index: {}]   ;;  %s439_s6 = inlined_call_operand.vmem [shape: f32[1,128], index: 6, kind: input, shape index: {}]   ;;  %s440_s7 = inlined_call_operand.hbm [shape: f32[8,128], index: 7, kind: output, shape index: {}]  }
   0x1   :  { %v29_v0 = vld [vmem:[%s434_s1] sm:$0xf]  ;;  %282 = vmatprep.subr.bf16.mxu0 %v345_v1  ;;  %284 = vmatprep.mubr.msk.bf16.mxu0 %vm346_vm2, %v345_v1  ;;  %v312_v5 = vld [vmem:[%s436_s3 + $0x8] sm:$0xff]  }
   0x2   :  { %v43_v2 = vsel %vm41_vm0, %v29_v0, 0  ;;  %v28_v3 = vld [vmem:[%s433_s0] sm:$0xf]  ;;  %288 = vmatprep.subr.bf16.mxu1 %v345_v1  ;;  %296 = vmatprep.mubr.msk.bf16.mxu1 %vm346_vm2, %v345_v1 }
   0x3   :  { %v311_v4 = vld [vmem:[%s436_s3] sm:$0xff]   ;;  %283 = vmatpush3.bf16.msra.mxu0 %v43_v2 }
   0x4   :  { %289 = vmatpush3.bf16.msra.mxu1 %v311_v4  ;;  %300 = vmatprep.subr.bf16.mxu0 %v345_v1 }
   0x5   :  { %290 = vmatprep.subr.bf16.mxu1 %v345_v1 }
   0x6   :  { %285 = vmatmul.mubr.msk.bf16.vlgmr.msra.gmra.mrb[0].mxu0 %vm37_vm1, %v28_v3 }
   0x7   :  { %304 = vmatprep.mubr.msk.bf16.mxu0 %vm346_vm2, %v345_v1 }
   0x8   :  { %12 = vsyncpa [#allocation3], 0  ;;  %291 = vmatpush3.bf16.msra.mxu1 %v312_v5  ;;  %v313_v6 = vld [vmem:[%s436_s3 + $0x10] sm:$0xff]   ;;  %v314_v7 = vld [vmem:[%s436_s3 + $0x18] sm:$0xff]   ;;  %vm126_vm3 = vcmask 523264   ;;  %vm200_vm4 = vcmask 261120  }
   0x9   :  { %292 = vmatprep.subr.bf16.mxu1 %v345_v1  ;;  %v259_v8 = vld [vmem:[%s435_s2] ss:$0 sm:$0xff]  ;;  %v316_v17 = vld [vmem:[%s438_s5 + $0x8] sm:$0xff]   ;;  %s347_s18 = smov [#allocation2]  }
   0xa   :  { %v315_v16 = vld [vmem:[%s438_s5] sm:$0xff]  }
   0xb   :  { %301 = vmatpush3.bf16.msra.mxu0 %v315_v16  ;;  %v261_v18 = vld [vmem:[%s437_s4] ss:$0 sm:$0xff]  ;;  %s251_s4 = sshll.u32 %s347_s18, 4  ;;  %s252_s4 = int_to_ptr.vmem [resolvable:$true] %s251_s4 }
   0xc   :  { %293 = vmatpush3.bf16.msra.mxu1 %v313_v6  ;;  %302 = vmatprep.subr.bf16.mxu0 %v345_v1  ;;  %v268_v29 = vld [vmem:[%s439_s6] ss:$0 sm:$0xff]  ;;  %s321_s19 = scalar_lea.vmem %s252_s4, 128  ;;  %p326_p1 = scmp.lt.s32.totalorder %s252_s4, %s252_s4 }
   0xd   :  { %294 = vmatprep.subr.bf16.mxu1 %v345_v1  ;;  %p322_p0 = scmp.ne.s32.totalorder %s252_s4, %s321_s19  ;;  %p327_p2 = scmp.lt.s32.totalorder %s321_s19, %s321_s19 }
   0xf   :  { %303 = vmatpush3.bf16.msra.mxu0 %v316_v17  ;;  %p328_p3 = por %p327_p2, %p326_p1 }
  0x10   :  { %295 = vmatpush3.bf16.msra.mxu1 %v314_v7 }
  0x11   :  { %p329_p4 = pnand %p328_p3, %p322_p0 }
  0xd9   :  { %v79_v9 = vpop.f32.mrb[0].mxu0 }
  0xda   :  { %v80_v10 = vadd.f32 %v259_v8, %v79_v9  ;;  %v286_v11 = vpop.f32.mrb[1].mxu0 }
  0xdb   :  { %v82_v12 = vpop.f32.mrb[2].mxu0 }
  0xdc   :  { %v85_v13 = vmax.f32 %v80_v10, 0.0  ;;  %v287_v14 = vpop.f32.mrb[3].mxu0 }
  0xde   :  { %v86_v15 = vpack.c.bf16 %v85_v13, %v85_v13 }
  0xe0   :  { %297 = vmatmul.mubr.msk.bf16.vlgmr.msra.gmra.mrb[0].mxu1 %vm126_vm3, %v86_v15 }
 0x1b3   :  { %v164_v19 = vpop.f32.mrb[0].mxu1 }
 0x1b4   :  { %v165_v20 = vadd.f32 %v261_v18, %v164_v19  ;;  %v298_v21 = vpop.f32.mrb[1].mxu1 }
 0x1b5   :  { %v167_v22 = vpop.f32.mrb[2].mxu1 }
 0x1b6   :  { %v267_v23 = vmul.f32 -1.442695, %v165_v20  ;;  %v299_v24 = vpop.f32.mrb[3].mxu1 }
 0x1b8   :  { %317 = vpow2.f32 %v267_v23 }
 0x1c2   :  { %v318_v25 = vpop.eup %317 }
 0x1c3   :  { %v173_v26 = vadd.f32 1.0, %v318_v25 }
 0x1c5   :  { %319 = vrcp.f32 %v173_v26 }
 0x1cf   :  { %v320_v27 = vpop.eup %319 }
 0x1d0   :  { %v176_v28 = vpack.c.bf16 %v320_v27, %v320_v27 }
 0x1d2   :  { %305 = vmatmul.mubr.msk.bf16.vlgmr.msra.gmra.mrb[4].mxu0 %vm200_vm4, %v176_v28 }
 0x2a5   :  { %v238_v30 = vpop.f32.mrb[4].mxu0 }
 0x2a6   :  { %v239_v31 = vadd.f32 %v268_v29, %v238_v30  ;;  %v306_v32 = vpop.f32.mrb[5].mxu0 }
 0x2a7   :  { %v241_v33 = vpop.f32.mrb[6].mxu0 }
 0x2a8   :  { %244 = vst [vmem:[#allocation2] sm:$0xff] %v239_v31  ;;  %v307_v34 = vpop.f32.mrb[7].mxu0 }
 0x2a9   :  { %332 = shalt.err (!%p329_p4)
}
 0x2aa   :  { %s333_s6 = scalar_lea.hbm %s440_s7, 128 }
 0x2ab   :  { %p334_p5 = scmp.ne.s32.totalorder %s440_s7, %s333_s6  ;;  %p337_p6 = scmp.lt.u32.totalorder %s333_s6, %s440_s7 }
 0x2ad   :  { %p339_p7 = pnand %p337_p6, %p334_p5 }
 0x2af   :  { %342 = shalt.err (!%p339_p7)
}
 0x2b0   :  { %254 = dma.vmem_to_hbm [thread:$0]  %s252_s4, 128, %s440_s7, [#allocation3]  }
 0x2b1   :  { %343 = dma.done.wait [#allocation3], 128  }
 0x2b2   :  { %344 = vsyncadd [#allocation3], 4294967168 }
 0x2b3   :  { %258 = vsyncpa [#allocation3], 1 }

</bundles_post_ra>
